<compile_context>
chip_gen: v5e
topology: v5e:2x2
jax: 0.10.0
libtpu: 0.0.40
codegen_flags: <defaults>
</compile_context>

<pallas_src>
import jax
import jax.numpy as jnp
from jax import lax
from jax.experimental import pallas as pl
from jax.experimental.pallas import tpu as pltpu


def _vmem_capacity_bytes():
    """Physical VMEM of the attached TPU; conservative 64 MiB (v7x per-TC) fallback."""
    try:
        info = pltpu.get_tpu_info()
        return int(getattr(info, "vmem_capacity_bytes", 64 * 1024 * 1024))
    except Exception:
        return 64 * 1024 * 1024


def _choose_tb(B, L, C, Cp, x_itemsize, w_itemsize, vmem_cap):
    """Pick the batch-tile size from a working-set model, not just the input block.

    Per (tb*L)-row block we count:
      * 2x double-buffered input block + 2x output block (true-C, x dtype),
      * in-kernel f32 temps: padded x, hm1, hp1, the (rows, 3*Cp) tap concat, h, y,
        out (~12 * Cp * 4 B/row) plus the compute-dtype copy fed to the MXU,
      * weights/biases resident once (counted double-buffered as a worst case even
        though Buffered(1) is requested).
    Budget is ~70% of physical VMEM so Mosaic internals / spills have headroom.
    """
    per_row = 4 * C * x_itemsize + 12 * Cp * 4 + 3 * Cp * w_itemsize
    weight_bytes = 2 * 2 * (3 * Cp * Cp * w_itemsize + Cp * 4)
    budget = int(0.70 * vmem_cap) - weight_bytes
    max_rows = max(budget // per_row, L)
    # Larger row targets amortize the ~0.35us per-grid-step overhead; keep the target
    # moderate on 64 MiB (v7x) parts, larger on 128 MiB (v5e/v6e).
    target_rows = 2048 if vmem_cap >= (96 << 20) else 512
    rows = min(max_rows, target_rows)
    tb = max(1, min(B, rows // max(L, 1)))
    # Keep >=4 grid steps (>=2 per TensorCore on v7x megacore) when B allows, >=2
    # otherwise, so input DMA / compute / writeback actually software-pipeline.
    if B >= 4:
        tb = min(tb, B // 4)
    elif B >= 2:
        tb = min(tb, B // 2)
    tb = max(tb, 1)
    while B % tb:          # keep the grid exactly divisible (no ragged last block)
        tb -= 1
    return tb


def _const_spec(shape):
    """BlockSpec for a grid-invariant input; single-buffer it when supported."""
    idx = lambda i: (0,) * len(shape)
    if hasattr(pl, "Buffered"):
        try:
            return pl.BlockSpec(shape, idx, pipeline_mode=pl.Buffered(1))
        except Exception:
            pass
    return pl.BlockSpec(shape, idx)


def resblock(x, w1, b1, w2, b2, *, compute_dtype=jnp.bfloat16):
    """x: (B, L, C); w*: (C_out, C_in, 3) (PyTorch Conv1d layout); b*: (C,).

    compute_dtype=jnp.bfloat16 (default) feeds the MXU in bf16 — native on
    v5e/v6e/v7x — with f32 accumulation and f32 bias/ReLU/residual math.
    Pass compute_dtype=jnp.float32 for a bit-tighter match to an f32 reference.
    """
    B, L, C = x.shape
    Cp = ((C + 127) // 128) * 128          # lane-dense channel width (multiple of 128)
    pad_c = Cp - C
    x_itemsize = jnp.dtype(x.dtype).itemsize
    w_itemsize = jnp.dtype(compute_dtype).itemsize

    def prep_w(w):
        # (C_out, C_in, 3) -> (3, C_in, C_out), zero-pad channels, merge taps along
        # the contraction axis -> (3*Cp, Cp); tap order matches [h[l-1], h[l], h[l+1]].
        wt = jnp.transpose(w, (2, 1, 0))
        wt = jnp.pad(wt, ((0, 0), (0, pad_c), (0, pad_c)))
        return wt.reshape(3 * Cp, Cp).astype(compute_dtype)

    def prep_b(b):
        return jnp.pad(b, (0, pad_c)).reshape(1, Cp).astype(jnp.float32)

    w1m, w2m = prep_w(w1), prep_w(w2)
    b1r, b2r = prep_b(b1), prep_b(b2)

    vmem_cap = _vmem_capacity_bytes()
    tb = _choose_tb(B, L, C, Cp, x_itemsize, w_itemsize, vmem_cap)
    grid = (B // tb,)
    vmem_limit = min(max(int(0.85 * vmem_cap), 32 << 20), 128 << 20)

    def resblock_kernel(x_ref, w1_ref, b1_ref, w2_ref, b2_ref, o_ref):
        # x_ref/o_ref: (tb, L, C)   w*_ref: (3*Cp, Cp)   b*_ref: (1, Cp)
        tb_, L_, _ = x_ref.shape
        rows = tb_ * L_

        x3 = x_ref[...].astype(jnp.float32)               # (tb, L, C)
        if pad_c:
            # Pad channels to the lane-dense width in VMEM (no wrapper HBM round-trip).
            x3 = jnp.concatenate(
                [x3, jnp.zeros((tb_, L_, pad_c), jnp.float32)], axis=-1)

        zrow = jnp.zeros((tb_, 1, Cp), jnp.float32)        # hoisted, reused by both convs

        def conv3(h3, w_ref, b_ref):
            # Shifted copies per sequence (zero at the edges) -> one fused MXU matmul.
            # NOTE(v5e): if vst/vld slots (not vmatmul) saturate, split this concat
            # into three accumulating dots against static slices of w_ref instead.
            if L_ > 1:
                hm1 = jnp.concatenate([zrow, h3[:, :L_ - 1, :]], axis=1)   # h[l-1]
                hp1 = jnp.concatenate([h3[:, 1:, :], zrow], axis=1)        # h[l+1]
            else:
                hm1 = jnp.zeros((tb_, L_, Cp), jnp.float32)
                hp1 = jnp.zeros((tb_, L_, Cp), jnp.float32)
            t = jnp.concatenate([hm1, h3, hp1], axis=-1)                   # (tb, L, 3Cp)
            # Reshape is layout-trivial when L % 8 == 0 (sublane tiling); bf16 MXU
            # feed with f32 accumulation.
            t2 = t.reshape(rows, 3 * Cp).astype(compute_dtype)
            y = jnp.dot(t2, w_ref[...], preferred_element_type=jnp.float32)
            return (y + b_ref[...]).reshape(tb_, L_, Cp)

        h = jnp.maximum(conv3(x3, w1_ref, b1_ref), 0.0)    # conv1 + ReLU
        y = conv3(h, w2_ref, b2_ref)                       # conv2
        out = jnp.maximum(x3 + y, 0.0)                     # residual + ReLU
        if pad_c:
            out = out[:, :, :C]                            # drop padded channels in VMEM
        o_ref[...] = out.astype(o_ref.dtype)

    # Advisory cost estimate for XLA's scheduler around the custom call.
    flops = 2 * 2 * B * L * (3 * Cp) * Cp
    bytes_accessed = (2 * B * L * C * x_itemsize
                      + 2 * 3 * Cp * Cp * w_itemsize
                      + 2 * Cp * 4)

    return pl.pallas_call(
        resblock_kernel,
        out_shape=jax.ShapeDtypeStruct((B, L, C), x.dtype),
        grid_spec=pltpu.PrefetchScalarGridSpec(
            num_scalar_prefetch=0,
            grid=grid,
            in_specs=[
                pl.BlockSpec((tb, L, C), lambda i: (i, 0, 0)),
                _const_spec((3 * Cp, Cp)),
                _const_spec((1, Cp)),
                _const_spec((3 * Cp, Cp)),
                _const_spec((1, Cp)),
            ],
            out_specs=pl.BlockSpec((tb, L, C), lambda i: (i, 0, 0)),
        ),
        compiler_params=pltpu.CompilerParams(
            dimension_semantics=("parallel",),
            vmem_limit_bytes=vmem_limit,
        ),
        cost_estimate=pl.CostEstimate(
            flops=flops, transcendentals=0, bytes_accessed=bytes_accessed),
    )(x, w1m, b1r, w2m, b2r)


def resblock_ref(x, w1, b1, w2, b2):
    """Pure-JAX reference matching the PyTorch module exactly."""
    xt = jnp.transpose(x, (0, 2, 1))                   # (B, C, L), like torch transpose(2,1)
    dn = ("NCH", "OIH", "NCH")
    c1 = lax.conv_general_dilated(xt, w1, (1,), [(1, 1)], dimension_numbers=dn)
    c1 = jnp.maximum(c1 + b1[None, :, None], 0.0)
    c2 = lax.conv_general_dilated(c1, w2, (1,), [(1, 1)], dimension_numbers=dn)
    c2 = c2 + b2[None, :, None]
    out = jnp.maximum(xt + c2, 0.0)
    return jnp.transpose(out, (0, 2, 1))


if __name__ == "__main__":
    B, L, C = 2, 16, 32                                # batch, seq_len, hidden_dim

    key = jax.random.PRNGKey(0)
    kx, kw1, kb1, kw2, kb2 = jax.random.split(key, 5)

    # Deterministic parameter init (PyTorch-default-like uniform(-1/sqrt(fan_in*k), +...))
    bound = 1.0 / (C * 3) ** 0.5
    w1 = jax.random.uniform(kw1, (C, C, 3), jnp.float32, -bound, bound)
    b1 = jax.random.uniform(kb1, (C,), jnp.float32, -bound, bound)
    w2 = jax.random.uniform(kw2, (C, C, 3), jnp.float32, -bound, bound)
    b2 = jax.random.uniform(kb2, (C,), jnp.float32, -bound, bound)

    x = jax.random.normal(kx, (B, L, C), jnp.float32)

    ref = jax.block_until_ready(resblock_ref(x, w1, b1, w2, b2))

    # f32 MXU feed: tight check against the f32 reference.
    out_f32 = jax.block_until_ready(
        resblock(x, w1, b1, w2, b2, compute_dtype=jnp.float32))
    assert out_f32.shape == (B, L, C)
    assert jnp.allclose(out_f32, ref, atol=1e-4, rtol=1e-4), "f32 mismatch vs reference"

    # Default bf16 MXU feed (f32 accumulation): ordinary mixed-precision tolerance.
    out_bf16 = jax.block_until_ready(resblock(x, w1, b1, w2, b2))
    assert out_bf16.shape == (B, L, C)
    assert jnp.allclose(out_bf16, ref, atol=5e-2, rtol=5e-2), "bf16 mismatch vs reference"

    print("KERNEL_OK")
</pallas_src>

<mosaic_0001>
module attributes {stable_mosaic.version = 11 : i64} {
  func.func @resblock_kernel(%arg0: i32, %arg1: memref<1x16x32xf32, #tpu.memory_space<vmem>>, %arg2: memref<384x128xf32, #tpu.memory_space<vmem>>, %arg3: memref<1x128xf32, #tpu.memory_space<vmem>>, %arg4: memref<384x128xf32, #tpu.memory_space<vmem>>, %arg5: memref<1x128xf32, #tpu.memory_space<vmem>>, %arg6: memref<1x16x32xf32, #tpu.memory_space<vmem>>) attributes {dimension_semantics = [#tpu.dimension_semantics<parallel>], iteration_bounds = array<i64: 2>, scalar_prefetch = 0 : i64, scratch_operands = 0 : i64, tpu.core_type = #tpu.core_type<tc>, window_params = [{transform_indices = @transform_0, window_bounds = array<i64: 1, 16, 32>}, {pipeline_mode = #tpu.pipeline_mode<synchronous>, transform_indices = @transform_1, window_bounds = array<i64: 384, 128>}, {pipeline_mode = #tpu.pipeline_mode<synchronous>, transform_indices = @transform_2, window_bounds = array<i64: 1, 128>}, {pipeline_mode = #tpu.pipeline_mode<synchronous>, transform_indices = @transform_3, window_bounds = array<i64: 384, 128>}, {pipeline_mode = #tpu.pipeline_mode<synchronous>, transform_indices = @transform_4, window_bounds = array<i64: 1, 128>}, {transform_indices = @transform_5, window_bounds = array<i64: 1, 16, 32>}]} {
    %c0 = arith.constant 0 : index
    %c0_0 = arith.constant 0 : index
    %c0_1 = arith.constant 0 : index
    %0 = vector.load %arg1[%c0, %c0_0, %c0_1] : memref<1x16x32xf32, #tpu.memory_space<vmem>>, vector<1x16x32xf32>
    %cst = arith.constant 0.000000e+00 : f32
    %1 = vector.broadcast %cst : f32 to vector<1x16x96xf32>
    %2 = tpu.concatenate %0, %1 in 2 : vector<1x16x32xf32>, vector<1x16x96xf32> -> vector<1x16x128xf32>
    %cst_2 = arith.constant 0.000000e+00 : f32
    %3 = vector.broadcast %cst_2 : f32 to vector<1x1x128xf32>
    %4 = vector.extract_strided_slice %2 {offsets = [0, 0, 0], sizes = [1, 15, 128], strides = [1, 1, 1]} : vector<1x16x128xf32> to vector<1x15x128xf32>
    %5 = tpu.concatenate %3, %4 in 1 : vector<1x1x128xf32>, vector<1x15x128xf32> -> vector<1x16x128xf32>
    %6 = vector.extract_strided_slice %2 {offsets = [0, 1, 0], sizes = [1, 15, 128], strides = [1, 1, 1]} : vector<1x16x128xf32> to vector<1x15x128xf32>
    %7 = tpu.concatenate %6, %3 in 1 : vector<1x15x128xf32>, vector<1x1x128xf32> -> vector<1x16x128xf32>
    %8 = tpu.concatenate %5, %2, %7 in 2 : vector<1x16x128xf32>, vector<1x16x128xf32>, vector<1x16x128xf32> -> vector<1x16x384xf32>
    %9 = vector.shape_cast %8 : vector<1x16x384xf32> to vector<16x384xf32>
    %c0_3 = arith.constant 0 : index
    %c0_4 = arith.constant 0 : index
    %10 = vector.load %arg2[%c0_3, %c0_4] : memref<384x128xf32, #tpu.memory_space<vmem>>, vector<384x128xf32>
    %cst_5 = arith.constant dense<0.000000e+00> : vector<16x128xf32>
    %11 = tpu.matmul %9, %10, %cst_5 {dimension_numbers = #tpu.dot_dimension_numbers<[1], [0], [0], [1], [0, 0, 1, 1], [], []>} : vector<16x384xf32>, vector<384x128xf32>, vector<16x128xf32> -> vector<16x128xf32>
    %c0_6 = arith.constant 0 : index
    %c0_7 = arith.constant 0 : index
    %12 = vector.load %arg3[%c0_6, %c0_7] : memref<1x128xf32, #tpu.memory_space<vmem>>, vector<1x128xf32>
    %13 = vector.broadcast %12 : vector<1x128xf32> to vector<16x128xf32>
    %14 = arith.addf %11, %13 : vector<16x128xf32>
    %15 = vector.shape_cast %14 : vector<16x128xf32> to vector<1x16x128xf32>
    %cst_8 = arith.constant 0.000000e+00 : f32
    %16 = vector.broadcast %cst_8 : f32 to vector<1x16x128xf32>
    %17 = arith.maximumf %15, %16 : vector<1x16x128xf32>
    %18 = vector.extract_strided_slice %17 {offsets = [0, 0, 0], sizes = [1, 15, 128], strides = [1, 1, 1]} : vector<1x16x128xf32> to vector<1x15x128xf32>
    %19 = tpu.concatenate %3, %18 in 1 : vector<1x1x128xf32>, vector<1x15x128xf32> -> vector<1x16x128xf32>
    %20 = vector.extract_strided_slice %17 {offsets = [0, 1, 0], sizes = [1, 15, 128], strides = [1, 1, 1]} : vector<1x16x128xf32> to vector<1x15x128xf32>
    %21 = tpu.concatenate %20, %3 in 1 : vector<1x15x128xf32>, vector<1x1x128xf32> -> vector<1x16x128xf32>
    %22 = tpu.concatenate %19, %17, %21 in 2 : vector<1x16x128xf32>, vector<1x16x128xf32>, vector<1x16x128xf32> -> vector<1x16x384xf32>
    %23 = vector.shape_cast %22 : vector<1x16x384xf32> to vector<16x384xf32>
    %c0_9 = arith.constant 0 : index
    %c0_10 = arith.constant 0 : index
    %24 = vector.load %arg4[%c0_9, %c0_10] : memref<384x128xf32, #tpu.memory_space<vmem>>, vector<384x128xf32>
    %cst_11 = arith.constant dense<0.000000e+00> : vector<16x128xf32>
    %25 = tpu.matmul %23, %24, %cst_11 {dimension_numbers = #tpu.dot_dimension_numbers<[1], [0], [0], [1], [0, 0, 1, 1], [], []>} : vector<16x384xf32>, vector<384x128xf32>, vector<16x128xf32> -> vector<16x128xf32>
    %c0_12 = arith.constant 0 : index
    %c0_13 = arith.constant 0 : index
    %26 = vector.load %arg5[%c0_12, %c0_13] : memref<1x128xf32, #tpu.memory_space<vmem>>, vector<1x128xf32>
    %27 = vector.broadcast %26 : vector<1x128xf32> to vector<16x128xf32>
    %28 = arith.addf %25, %27 : vector<16x128xf32>
    %29 = vector.shape_cast %28 : vector<16x128xf32> to vector<1x16x128xf32>
    %30 = arith.addf %2, %29 : vector<1x16x128xf32>
    %cst_14 = arith.constant 0.000000e+00 : f32
    %31 = vector.broadcast %cst_14 : f32 to vector<1x16x128xf32>
    %32 = arith.maximumf %30, %31 : vector<1x16x128xf32>
    %33 = vector.extract_strided_slice %32 {offsets = [0, 0, 0], sizes = [1, 16, 32], strides = [1, 1, 1]} : vector<1x16x128xf32> to vector<1x16x32xf32>
    %c0_15 = arith.constant 0 : index
    %c0_16 = arith.constant 0 : index
    %c0_17 = arith.constant 0 : index
    %34 = vector.load %arg6[%c0_15, %c0_16, %c0_17] : memref<1x16x32xf32, #tpu.memory_space<vmem>>, vector<1x16x32xf32>
    tpu.vector_store %arg6[%c0_15, %c0_16, %c0_17], %33 {strides = array<i32>} : memref<1x16x32xf32, #tpu.memory_space<vmem>>, vector<1x16x32xf32>,
    return
  }
  func.func @transform_0(%arg0: i32) -> (i32, i32, i32) {
    %c0_i32 = arith.constant 0 : i32
    %c0_i32_0 = arith.constant 0 : i32
    %c0_i32_1 = arith.constant 0 : i32
    return %arg0, %c0_i32, %c0_i32_0 : i32, i32, i32
  }
  func.func @transform_1(%arg0: i32) -> (i32, i32) {
    %c0_i32 = arith.constant 0 : i32
    %c0_i32_0 = arith.constant 0 : i32
    %c0_i32_1 = arith.constant 0 : i32
    return %c0_i32, %c0_i32_0 : i32, i32
  }
  func.func @transform_2(%arg0: i32) -> (i32, i32) {
    %c0_i32 = arith.constant 0 : i32
    %c0_i32_0 = arith.constant 0 : i32
    %c0_i32_1 = arith.constant 0 : i32
    return %c0_i32, %c0_i32_0 : i32, i32
  }
  func.func @transform_3(%arg0: i32) -> (i32, i32) {
    %c0_i32 = arith.constant 0 : i32
    %c0_i32_0 = arith.constant 0 : i32
    %c0_i32_1 = arith.constant 0 : i32
    return %c0_i32, %c0_i32_0 : i32, i32
  }
  func.func @transform_4(%arg0: i32) -> (i32, i32) {
    %c0_i32 = arith.constant 0 : i32
    %c0_i32_0 = arith.constant 0 : i32
    %c0_i32_1 = arith.constant 0 : i32
    return %c0_i32, %c0_i32_0 : i32, i32
  }
  func.func @transform_5(%arg0: i32) -> (i32, i32, i32) {
    %c0_i32 = arith.constant 0 : i32
    %c0_i32_0 = arith.constant 0 : i32
    %c0_i32_1 = arith.constant 0 : i32
    return %arg0, %c0_i32, %c0_i32_0 : i32, i32, i32
  }
}

</mosaic_0001>

<bundles_post_ra>
// kernel: tpu_custom_call.1
= control target key start
LH: loop header
LB: loop body
LE: loop exit
PB: predicated region body
PF: predicated region fallthrough
CT: control target
= control target key end

     0   :  { %10 = vsyncpa [#allocation3], 0  ;;  %s1205_s0 = inlined_call_operand.hbm [shape: f32[2,16,32], index: 0, kind: input, shape index: {}]   ;;  %s1206_s1 = inlined_call_operand.hbm [shape: f32[384,128], index: 1, kind: input, shape index: {}]   ;;  %s1207_s2 = inlined_call_operand.vmem [shape: f32[1,128], index: 2, kind: input, shape index: {}]   ;;  %s1208_s3 = inlined_call_operand.hbm [shape: f32[384,128], index: 3, kind: input, shape index: {}]   ;;  %s1209_s4 = inlined_call_operand.vmem [shape: f32[1,128], index: 4, kind: input, shape index: {}]   ;;  %s1210_s5 = inlined_call_operand.hbm [shape: f32[2,16,32], index: 5, kind: output, shape index: {}]  }
   0x1   :  { %12 = vsyncpa [#allocation3 + $0x1], 0 }
   0x2   :  { %13 = vsyncpa [#allocation6], 0 }
   0x3   :  { %14 = vsyncpa [#allocation4], 0 }
   0x4   :  { %16 = vsyncpa [#allocation4 + $0x1], 0  ;;  %s1002_s18 = smov 0   ;;  %s1004_s19 = smov 0  }
   0x5   :  { %s1006_s20 = smov 0   ;;  %s1008_s21 = smov 0  }
   0x6 LB: > { %s1023_s22 = sadd.s32 4294967295, %s964_s21   ;;  %s671_s23 = sadd.s32 4294967294, %s964_s21   ;;  %s964_s21 = sphi %s1008_s21, %s1224_s21   ;;  %s960_s20 = sphi %s1006_s20, %s1223_s20   ;;  %s956_s19 = sphi %s1004_s19, %s1222_s19   ;;  %s952_s18 = sphi %s1002_s18, %s1221_s18  }
   0x7   : > { %p42_p0 = scmp.ne.s32.totalorder %s956_s19, %s952_s18  ;;  %p43_p1 = scmp.eq.s32.totalorder %s1023_s22, 0 }
   0x8   : > { %p150_p2 = scmp.eq.s32.totalorder %s1023_s22, 1  ;;  %p156_p3 = scmp.eq.s32.totalorder %s671_s23, 1 }
   0x9   : > { %p1032_p4 = por %p43_p1, %p42_p0  ;;  %p672_p5 = scmp.ge.s32.totalorder %s964_s21, 1 }
   0xa   : > { %p1037_p6 = por %p156_p3, %p42_p0  ;;  %p163_p7 = scmp.lt.s32.totalorder %s964_s21, 3 }
   0xb   : > { %s174_s28 = sshll.u32 %s1206_s1, 4  ;;  %s966_s30 = smov [#allocation5]   ;;  %s175_s28 = int_to_ptr.hbm [resolvable:$true] %s174_s28 }
   0xc   : > { %p1045_p8 = pnand %p672_p5, %p163_p7  ;;  %s176_s6 = sshll.u32 %s966_s30, 4  ;;  %s177_s6 = int_to_ptr.vmem [resolvable:$true] %s176_s6 }
   0xd   : > { %s191_s9 = sshll.u32 %s1208_s3, 4  ;;  %s1211_s10 = smov 128   ;;  %s192_s9 = int_to_ptr.hbm [resolvable:$true] %s191_s9 }
   0xe   : > { %p743_p9 = pneg %p1045_p8  ;;  %s968_s11 = smov 8  }
   0xf   : > { %s969_s12 = smov [#allocation7]   ;;  %s1064_s14 = sadd.s32 1, %s964_s21  }
  0x10   : > { %p744_p10 = pnand %p743_p9, %p43_p1  ;;  %s193_s13 = sshll.u32 %s969_s12, 4  ;;  %s194_s13 = int_to_ptr.vmem [resolvable:$true] %s193_s13 }
  0x11   : > { %s29_s15 = sadd.s32 1, %s960_s20  ;;  %s26_s16 = ssub.s32 %s964_s21, %s1064_s14 }
  0x12   : > { %746 = dma.hbm_to_vmem [thread:$0]  (!%p744_p10), %s175_s28, 6144, %s177_s6, [#allocation6], %s1211_s10, %s1211_s10, %s968_s11  }
  0x13   : > { %749 = dma.hbm_to_vmem [thread:$0]  (!%p744_p10), %s192_s9, 6144, %s194_s13, [#allocation6], %s1211_s10, %s1211_s10, %s968_s11  }
  0x14   : > { %p36_p12 = scmp.ne.s32.totalorder %s960_s20, %s956_s19  ;;  %p27_p13 = scmp.eq.s32.totalorder %s26_s16, 0 }
  0x15   : > { %p37_p0 = scmp.eq.s32.totalorder %s964_s21, 0  ;;  %p760_p5 = scmp.lt.s32.totalorder %s964_s21, 2 }
  0x16   : > { %p1074_p3 = por %p150_p2, %p36_p12  ;;  %s210_s26 = sand.u32 1, %s960_s20  }
  0x17   : > { %s1080_s23 = scalar_select %p27_p13, %s960_s20, %s29_s15  }
  0x18   : > { %p38_p7 = por %p37_p0, %p36_p12  ;;  %s676_s27 = sshll.u32 %s210_s26, 4 }
  0x19   : > { %s697_s28 = sshll.u32 %s964_s21, 4  ;;  %s214_s8 = scalar_lea.vmem [#allocation2], %s676_s27 }
  0x1a   : > { %s219_s7 = scalar_lea.hbm %s1205_s0, %s697_s28  ;;  %s222_s9 = sshll.u32 %s214_s8, 4  ;;  %s223_s9 = int_to_ptr.vmem [resolvable:$true] %s222_s9 }
  0x1b   : > { %s220_s12 = sshll.u32 %s219_s7, 4  ;;  %p1087_p2 = pnand %p760_p5, %p38_p7  ;;  %s221_s12 = int_to_ptr.hbm [resolvable:$true] %s220_s12 }
  0x1c   : > { %s211_s15 = scalar_lea.sflag [#allocation3], %s210_s26  ;;  %s864_s16 = sshra.s32 %s221_s12, 4  ;;  %s865_s16 = int_to_ptr.hbm [resolvable:$true] %s864_s16 }
  0x1d   : > { %s866_s10 = scalar_lea.hbm %s865_s16, 16  ;;  %p868_p10 = pneg %p1087_p2 }
  0x1e   : > { %p867_p9 = scmp.ne.s32.totalorder %s865_s16, %s866_s10  ;;  %s871_s30 = scalar_lea.hbm %s1205_s0, 32 }
  0x1f   : > { %p872_p0 = scmp.lt.s32.totalorder %s865_s16, %s1205_s0  ;;  %p873_p5 = scmp.lt.s32.totalorder %s871_s30, %s866_s10 }
  0x20   : > { %p869_p12 = pnand %p868_p10, %p867_p9 }
  0x21   : > { %p874_p7 = por %p873_p5, %p872_p0 }
  0x22   : > { %p870_p13 = pneg %p869_p12 }
  0x24   : > { %p875_p11 = pnand %p874_p7, %p870_p13 }
  0x26   : > { %878 = shalt.err (!%p875_p11)
}
  0x27   : > { %s1217_s26 = smov 128   ;;  %234 = sbr.rel (%p1045_p8) target bundleno = 376 (0x178), region = 40 }
  0x28   : > { %753 = dma.hbm_to_vmem [thread:$0]  (!%p1087_p2), %s221_s12, 256, %s223_s9, %s211_s15, %s1217_s26, %s1217_s26, %s968_s11  }
  0x29   : > { %s1107_s8 = sand.u32 (!%p1045_p8), 1, %s956_s19  }
  0x2a   : > { %s680_s10 = sshll.u32 (!%p1045_p8), %s1107_s8, 4  ;;  %s237_s16 = scalar_lea.sflag (!%p1045_p8), [#allocation3], %s1107_s8 }
  0x2b   : > { %s1113_s28 = scalar_lea.vmem (!%p1045_p8), [#allocation2], %s680_s10 }
  0x2c   : > { %939 = dma.done.wait (%p1032_p4), %s237_s16, 256  }
  0x2d   : > { %941 = vsyncadd (%p1032_p4), %s237_s16, 4294967040 }
  0x2e   : > { %943 = dma.done.wait (%p43_p1), [#allocation6], 12288  }
  0x2f   : > { %945 = vsyncadd (%p43_p1), [#allocation6], 4294955008  ;;  %v346_v0 = vld [vmem:[#allocation5 + $0x178] sm:$0xff]  ;;  %v345_v2 = vld [vmem:[#allocation5 + $0x170] sm:$0xff]  ;;  %vm280_vm0 = vcmask 261120   ;;  %vm292_vm1 = vcmask 1046528  }
  0x30   : > { %v314_v1 = vld [vmem:[#allocation5 + $0x78] sm:$0xff]  ;;  %397 = vmatpush.msra.mxu2 %v346_v0  ;;  %v313_v3 = vld [vmem:[#allocation5 + $0x70] sm:$0xff]  ;;  %v344_v5 = vld [vmem:[#allocation5 + $0x168] sm:$0xff]  ;;  %vm285_vm2 = vcmask 1040384   ;;  %s277_s12 = scalar_lea.vmem [#allocation8], %s680_s10  ;;  %s698_s13 = sshll.u32 %s1023_s22, 4 }
  0x31   : > { %351 = vmatpush.msra.mxu0 %v314_v1  ;;  %v330_v4 = vld [vmem:[#allocation5 + $0xf8] sm:$0xff]  ;;  %v312_v6 = vld [vmem:[#allocation5 + $0x68] sm:$0xff]  ;;  %v329_v7 = vld [vmem:[#allocation5 + $0xf0] sm:$0xff]  ;;  %s575_s30 = scalar_lea.hbm %s1210_s5, %s698_s13  ;;  %s576_s6 = sshll.u32 %s277_s12, 4  ;;  %s577_s6 = int_to_ptr.vmem [resolvable:$true] %s576_s6 }
  0x32   : > { %374 = vmatpush.msra.mxu1 %v330_v4  ;;  %398 = vmatpush.msra.mxu2 %v345_v2  ;;  %v328_v8 = vld [vmem:[#allocation5 + $0xe8] sm:$0xff]  ;;  %v343_v9 = vld [vmem:[#allocation5 + $0x160] sm:$0xff]  ;;  %v342_v12 = vld [vmem:[#allocation5 + $0x158] sm:$0xff]  ;;  %s578_s7 = sshll.u32 %s575_s30, 4  ;;  %s564_s26 = scalar_lea.sflag [#allocation4], %s1107_s8  ;;  %s579_s7 = int_to_ptr.hbm [resolvable:$true] %s578_s7 }
  0x33   : > { %352 = vmatpush.msra.mxu0 %v313_v3  ;;  %v311_v10 = vld [vmem:[#allocation5 + $0x60] sm:$0xff]  ;;  %v310_v13 = vld [vmem:[#allocation5 + $0x58] sm:$0xff]  ;;  %v341_v15 = vld [vmem:[#allocation5 + $0x150] sm:$0xff]  ;;  %s908_s22 = sshra.s32 %s579_s7, 4  ;;  %s914_s24 = scalar_lea.hbm %s1210_s5, 32  ;;  %s909_s22 = int_to_ptr.hbm [resolvable:$true] %s908_s22 }
  0x34   : > { %375 = vmatpush.msra.mxu1 %v329_v7  ;;  %399 = vmatpush.msra.mxu2 %v344_v5  ;;  %v327_v11 = vld [vmem:[#allocation5 + $0xe0] sm:$0xff]  ;;  %v326_v14 = vld [vmem:[#allocation5 + $0xd8] sm:$0xff]  ;;  %v309_v16 = vld [vmem:[#allocation5 + $0x50] sm:$0xff]  ;;  %s910_s10 = scalar_lea.hbm %s909_s22, 16  ;;  %p915_p11 = scmp.lt.s32.totalorder %s909_s22, %s1210_s5 }
  0x35   : > { %353 = vmatpush.msra.mxu0 %v312_v6  ;;  %v325_v17 = vld [vmem:[#allocation5 + $0xd0] sm:$0xff]  ;;  %v340_v18 = vld [vmem:[#allocation5 + $0x148] sm:$0xff]  ;;  %v339_v21 = vld [vmem:[#allocation5 + $0x140] sm:$0xff]  ;;  %p911_p1 = scmp.ne.s32.totalorder %s909_s22, %s910_s10  ;;  %p916_p2 = scmp.lt.s32.totalorder %s914_s24, %s910_s10 }
  0x36   : > { %376 = vmatpush.msra.mxu1 %v328_v8  ;;  %400 = vmatpush.msra.mxu2 %v343_v9  ;;  %v308_v19 = vld [vmem:[#allocation5 + $0x48] sm:$0xff]  ;;  %v307_v22 = vld [vmem:[#allocation5 + $0x40] sm:$0xff]  ;;  %v338_v24 = vld [vmem:[#allocation5 + $0x138] sm:$0xff] }
  0x37   : > { %354 = vmatpush.msra.mxu0 %v311_v10  ;;  %v324_v20 = vld [vmem:[#allocation5 + $0xc8] sm:$0xff]  ;;  %v323_v23 = vld [vmem:[#allocation5 + $0xc0] sm:$0xff]  ;;  %v306_v25 = vld [vmem:[#allocation5 + $0x38] sm:$0xff]  ;;  %p912_p4 = pnand %p911_p1, %p1074_p3  ;;  %p917_p9 = por %p916_p2, %p915_p11 }
  0x38   : > { %377 = vmatpush.msra.mxu1 %v327_v11  ;;  %401 = vmatpush.msra.mxu2 %v342_v12  ;;  %v322_v26 = vld [vmem:[#allocation5 + $0xb8] sm:$0xff]  ;;  %v337_v27 = vld [vmem:[#allocation5 + $0x130] sm:$0xff]  ;;  %v336_v32 = vld [vmem:[#allocation5 + $0x128] sm:$0xff] }
  0x39   : > { %355 = vmatpush.msra.mxu0 %v310_v13  ;;  %v305_v28 = vld [vmem:[#allocation5 + $0x30] sm:$0xff]  ;;  %v451_v30 = vld [vmem:[#allocation7 + $0x78] sm:$0xff]  ;;  %v304_v33 = vld [vmem:[#allocation5 + $0x28] sm:$0xff]  ;;  %p913_p8 = pneg %p912_p4 }
  0x3a   : > { %378 = vmatpush.msra.mxu1 %v326_v14  ;;  %402 = vmatpush.msra.mxu2 %v341_v15  ;;  %v321_v29 = vld [vmem:[#allocation5 + $0xb0] sm:$0xff]  ;;  %v320_v34 = vld [vmem:[#allocation5 + $0xa8] sm:$0xff]  ;;  %v335_v38 = vld [vmem:[#allocation5 + $0x120] sm:$0xff] }
  0x3b   : > { %356 = vmatpush.msra.mxu0 %v309_v16  ;;  %v450_v31 = vld [vmem:[#allocation7 + $0x70] sm:$0xff]  ;;  %488 = vmatpush.msra.mxu3 %v451_v30  ;;  %v1127_v36 = vld [vmem:[%s1113_s28 + $0x8] sm:$0xff]  ;;  %v303_v39 = vld [vmem:[#allocation5 + $0x20] sm:$0xff]  ;;  %p918_p10 = pnand %p917_p9, %p913_p8 }
  0x3c   : > { %379 = vmatpush.msra.mxu1 %v325_v17  ;;  %403 = vmatpush.msra.mxu2 %v340_v18  ;;  %v1124_v35 = vld [vmem:[%s1113_s28] sm:$0xff]  ;;  %v449_v37 = vld [vmem:[#allocation7 + $0x68] sm:$0xff]  ;;  %v334_v42 = vld [vmem:[#allocation5 + $0x118] sm:$0xff]  ;;  %v1135_v45 = vsel %vm280_vm0, %v1127_v36, 0.0 }
  0x3d   : > { %357 = vmatpush.msra.mxu0 %v308_v19  ;;  %489 = vmatpush.msra.mxu3 %v450_v31  ;;  %v319_v40 = vld [vmem:[#allocation5 + $0xa0] sm:$0xff]  ;;  %v302_v43 = vld [vmem:[#allocation5 + $0x18] sm:$0xff]  ;;  %v1131_v44 = vsel %vm280_vm0, %v1124_v35, 0.0  ;;  %v333_v48 = vld [vmem:[#allocation5 + $0x110] sm:$0xff]  ;;  %v294_v52 = vrot.slane %v1135_v45, 1  ;;  %v287_v3 = vrot.slane %v1135_v45, 7 }
  0x3e   : > { %380 = vmatpush.msra.mxu1 %v324_v20  ;;  %404 = vmatpush.msra.mxu2 %v339_v21  ;;  %v448_v41 = vld [vmem:[#allocation7 + $0x60] sm:$0xff]  ;;  %v318_v46 = vld [vmem:[#allocation5 + $0x98] sm:$0xff]  ;;  %v301_v49 = vld [vmem:[#allocation5 + $0x10] sm:$0xff]  ;;  %v293_v51 = vrot.slane %v1131_v44, 1  ;;  %v286_v60 = vrot.slane %v1131_v44, 7 }
  0x3f   : > { %358 = vmatpush.msra.mxu0 %v307_v22  ;;  %490 = vmatpush.msra.mxu3 %v449_v37  ;;  %v447_v47 = vld [vmem:[#allocation7 + $0x58] sm:$0xff]  ;;  %v317_v50 = vld [vmem:[#allocation5 + $0x90] sm:$0xff]  ;;  %v332_v54 = vld [vmem:[#allocation5 + $0x108] sm:$0xff] }
  0x40   : > { %381 = vmatpush.msra.mxu1 %v323_v23  ;;  %405 = vmatpush.msra.mxu2 %v338_v24  ;;  %v446_v53 = vld [vmem:[#allocation7 + $0x50] sm:$0xff]  ;;  %v300_v55 = vld [vmem:[#allocation5 + $0x8] sm:$0xff]  ;;  %v331_v58 = vld [vmem:[#allocation5 + $0x100] sm:$0xff]  ;;  %v295_v61 = vsel %vm292_vm1, %v293_v51, %v294_v52  ;;  %v288_v10 = vsel %vm285_vm2, %v286_v60, %v287_v3 }
  0x41   : > { %359 = vmatpush.msra.mxu0 %v306_v25  ;;  %491 = vmatpush.msra.mxu3 %v448_v41  ;;  %v316_v56 = vld [vmem:[#allocation5 + $0x88] sm:$0xff]  ;;  %v299_v59 = vld [vmem:[#allocation5] sm:$0xff]  ;;  %vm1142_vm3 = vmneg %vm285_vm2 }
  0x42   : > { %382 = vmatpush.msra.mxu1 %v322_v26  ;;  %406 = vmatpush.msra.mxu2 %v337_v27  ;;  %v445_v57 = vld [vmem:[#allocation7 + $0x48] sm:$0xff]  ;;  %v315_v63 = vld [vmem:[#allocation5 + $0x80] sm:$0xff]  ;;  %v467_v0 = vld [vmem:[#allocation7 + $0xf8] sm:$0xff] }
  0x43   : > { %360 = vmatpush.msra.mxu0 %v305_v28  ;;  %492 = vmatpush.msra.mxu3 %v447_v47  ;;  %v444_v1 = vld [vmem:[#allocation7 + $0x40] sm:$0xff]  ;;  %v466_v2 = vld [vmem:[#allocation7 + $0xf0] sm:$0xff]  ;;  %v443_v4 = vld [vmem:[#allocation7 + $0x38] sm:$0xff] }
  0x44   : > { %383 = vmatpush.msra.mxu1 %v321_v29  ;;  %407 = vmatpush.msra.mxu2 %v336_v32  ;;  %v483_v5 = vld [vmem:[#allocation7 + $0x178] sm:$0xff]  ;;  %v465_v6 = vld [vmem:[#allocation7 + $0xe8] sm:$0xff]  ;;  %v442_v7 = vld [vmem:[#allocation7 + $0x30] sm:$0xff] }
  0x45   : > { %361 = vmatpush.msra.mxu0 %v304_v33  ;;  %493 = vmatpush.msra.mxu3 %v446_v53  ;;  %v482_v8 = vld [vmem:[#allocation7 + $0x170] sm:$0xff]  ;;  %v464_v9 = vld [vmem:[#allocation7 + $0xe0] sm:$0xff]  ;;  %v441_v11 = vld [vmem:[#allocation7 + $0x28] sm:$0xff] }
  0x46   : > { %384 = vmatpush.msra.mxu1 %v320_v34  ;;  %408 = vmatpush.msra.mxu2 %v335_v38  ;;  %v463_v12 = vld [vmem:[#allocation7 + $0xd8] sm:$0xff]  ;;  %v440_v13 = vld [vmem:[#allocation7 + $0x20] sm:$0xff]  ;;  %v462_v14 = vld [vmem:[#allocation7 + $0xd0] sm:$0xff] }
  0x47   : > { %362 = vmatpush.msra.mxu0 %v303_v39  ;;  %494 = vmatpush.msra.mxu3 %v445_v57  ;;  %v481_v15 = vld [vmem:[#allocation7 + $0x168] sm:$0xff]  ;;  %v439_v16 = vld [vmem:[#allocation7 + $0x18] sm:$0xff]  ;;  %v480_v18 = vld [vmem:[#allocation7 + $0x160] sm:$0xff] }
  0x48   : > { %385 = vmatpush.msra.mxu1 %v319_v40  ;;  %409 = vmatpush.msra.mxu2 %v334_v42  ;;  %v461_v17 = vld [vmem:[#allocation7 + $0xc8] sm:$0xff]  ;;  %v438_v19 = vld [vmem:[#allocation7 + $0x10] sm:$0xff]  ;;  %v460_v20 = vld [vmem:[#allocation7 + $0xc0] sm:$0xff] }
  0x49   : > { %363 = vmatpush.msra.mxu0 %v302_v43  ;;  %495 = vmatpush.msra.mxu3 %v444_v1  ;;  %v479_v21 = vld [vmem:[#allocation7 + $0x158] sm:$0xff]  ;;  %v437_v22 = vld [vmem:[#allocation7 + $0x8] sm:$0xff]  ;;  %v478_v24 = vld [vmem:[#allocation7 + $0x150] sm:$0xff] }
  0x4a   : > { %386 = vmatpush.msra.mxu1 %v318_v46  ;;  %410 = vmatpush.msra.mxu2 %v333_v48  ;;  %v459_v23 = vld [vmem:[#allocation7 + $0xb8] sm:$0xff]  ;;  %v436_v25 = vld [vmem:[#allocation7] sm:$0xff]  ;;  %v458_v26 = vld [vmem:[#allocation7 + $0xb0] sm:$0xff] }
  0x4b   : > { %364 = vmatpush.msra.mxu0 %v301_v49  ;;  %496 = vmatpush.msra.mxu3 %v443_v4  ;;  %v457_v27 = vld [vmem:[#allocation7 + $0xa8] sm:$0xff]  ;;  %v456_v28 = vld [vmem:[#allocation7 + $0xa0] sm:$0xff]  ;;  %v455_v30 = vld [vmem:[#allocation7 + $0x98] sm:$0xff] }
  0x4c   : > { %387 = vmatpush.msra.mxu1 %v317_v50  ;;  %411 = vmatpush.msra.mxu2 %v332_v54  ;;  %v477_v29 = vld [vmem:[#allocation7 + $0x148] sm:$0xff]  ;;  %v476_v31 = vld [vmem:[#allocation7 + $0x140] sm:$0xff]  ;;  %v454_v32 = vld [vmem:[#allocation7 + $0x90] sm:$0xff] }
  0x4d   : > { %365 = vmatpush.msra.mxu0 %v300_v55  ;;  %497 = vmatpush.msra.mxu3 %v442_v7  ;;  %v475_v33 = vld [vmem:[#allocation7 + $0x138] sm:$0xff]  ;;  %v453_v34 = vld [vmem:[#allocation7 + $0x88] sm:$0xff]  ;;  %v472_v38 = vld [vmem:[#allocation7 + $0x120] sm:$0xff] }
  0x4e   : > { %388 = vmatpush.msra.mxu1 %v316_v56  ;;  %412 = vmatpush.msra.mxu2 %v331_v58  ;;  %v473_v37 = vld [vmem:[#allocation7 + $0x128] sm:$0xff]  ;;  %v471_v39 = vld [vmem:[#allocation7 + $0x118] sm:$0xff]  ;;  %v470_v40 = vld [vmem:[#allocation7 + $0x110] sm:$0xff] }
  0x4f   : > { %366 = vmatpush.msra.mxu0 %v299_v59  ;;  %413 = vmatmul.f32.vlgmr.msra.gmra.mxu2 %v295_v61  ;;  %v469_v41 = vld [vmem:[#allocation7 + $0x108] sm:$0xff]  ;;  %v468_v42 = vld [vmem:[#allocation7 + $0x100] sm:$0xff] }
  0x50   : > { %685 = vmatmul.msk.f32.vlgmr.msra.gmra.mxu0 %vm1142_vm3, %v286_v60  ;;  %389 = vmatpush.msra.mxu1 %v315_v63  ;;  %v802_v43 = vld [vmem:[%s1207_s2] ss:$0 sm:$0xff] }
  0x51   : > { %511 = vmatpush.msrb.mxu0 %v467_v0  ;;  %686 = vmatmul.msk.f32.vlgmr.msra.gmra.mxu1 %vm280_vm0, %v1124_v35  ;;  %v474_v35 = vld [vmem:[#allocation7 + $0x130] sm:$0xff]  ;;  %v803_v62 = vld [vmem:[%s1209_s4] ss:$0 sm:$0xff] }
  0x52   : > { %699 = vmatpush.msrb.mxu2 %v467_v0  ;;  %534 = vmatpush.msrb.mxu1 %v483_v5 }
  0x53   : > { %512 = vmatpush.msrb.mxu0 %v466_v2  ;;  %498 = vmatpush.msra.mxu3 %v441_v11 }
  0x54   : > { %700 = vmatpush.msrb.mxu2 %v466_v2  ;;  %535 = vmatpush.msrb.mxu1 %v482_v8 }
  0x55   : > { %513 = vmatpush.msrb.mxu0 %v465_v6  ;;  %499 = vmatpush.msra.mxu3 %v440_v13 }
  0x56   : > { %701 = vmatpush.msrb.mxu2 %v465_v6  ;;  %536 = vmatpush.msrb.mxu1 %v481_v15 }
  0x57   : > { %514 = vmatpush.msrb.mxu0 %v464_v9  ;;  %688 = vmatmul.msk.f32.gmra.mxu2 %vm292_vm1, %v294_v52 }
  0x58   : > { %370 = vmatmul.f32.gmra.mxu0 %v288_v10  ;;  %702 = vmatpush.msrb.mxu2 %v464_v9 }
  0x59   : > { %515 = vmatpush.msrb.mxu0 %v463_v12  ;;  %687 = vmatmul.msk.f32.gmra.mxu1 %vm280_vm0, %v1127_v36  ;;  %v452_v36 = vld [vmem:[#allocation7 + $0x80] sm:$0xff] }
  0x5a   : > { %703 = vmatpush.msrb.mxu2 %v463_v12  ;;  %500 = vmatpush.msra.mxu3 %v439_v16 }
  0x5b   : > { %516 = vmatpush.msrb.mxu0 %v462_v14  ;;  %537 = vmatpush.msrb.mxu1 %v480_v18 }
  0x5c   : > { %704 = vmatpush.msrb.mxu2 %v462_v14  ;;  %501 = vmatpush.msra.mxu3 %v438_v19 }
  0x5d   : > { %517 = vmatpush.msrb.mxu0 %v461_v17  ;;  %538 = vmatpush.msrb.mxu1 %v479_v21 }
  0x5e   : > { %705 = vmatpush.msrb.mxu2 %v461_v17  ;;  %502 = vmatpush.msra.mxu3 %v437_v22 }
  0x5f   : > { %518 = vmatpush.msrb.mxu0 %v460_v20  ;;  %539 = vmatpush.msrb.mxu1 %v478_v24 }
  0x60   : > { %706 = vmatpush.msrb.mxu2 %v460_v20  ;;  %503 = vmatpush.msra.mxu3 %v436_v25 }
  0x61   : > { %519 = vmatpush.msrb.mxu0 %v459_v23  ;;  %540 = vmatpush.msrb.mxu1 %v477_v29 }
  0x62   : > { %715 = vmatpush.msrb.mxu3 %v483_v5  ;;  %707 = vmatpush.msrb.mxu2 %v459_v23 }
  0x63   : > { %520 = vmatpush.msrb.mxu0 %v458_v26  ;;  %541 = vmatpush.msrb.mxu1 %v476_v31 }
  0x64   : > { %716 = vmatpush.msrb.mxu3 %v482_v8  ;;  %708 = vmatpush.msrb.mxu2 %v458_v26 }
  0x65   : > { %521 = vmatpush.msrb.mxu0 %v457_v27  ;;  %542 = vmatpush.msrb.mxu1 %v475_v33 }
  0x66   : > { %717 = vmatpush.msrb.mxu3 %v481_v15  ;;  %709 = vmatpush.msrb.mxu2 %v457_v27 }
  0x67   : > { %522 = vmatpush.msrb.mxu0 %v456_v28  ;;  %543 = vmatpush.msrb.mxu1 %v474_v35 }
  0x68   : > { %718 = vmatpush.msrb.mxu3 %v480_v18  ;;  %710 = vmatpush.msrb.mxu2 %v456_v28 }
  0x69   : > { %523 = vmatpush.msrb.mxu0 %v455_v30  ;;  %544 = vmatpush.msrb.mxu1 %v473_v37 }
  0x6a   : > { %719 = vmatpush.msrb.mxu3 %v479_v21  ;;  %711 = vmatpush.msrb.mxu2 %v455_v30 }
  0x6b   : > { %524 = vmatpush.msrb.mxu0 %v454_v32  ;;  %545 = vmatpush.msrb.mxu1 %v472_v38 }
  0x6c   : > { %720 = vmatpush.msrb.mxu3 %v478_v24  ;;  %712 = vmatpush.msrb.mxu2 %v454_v32 }
  0x6d   : > { %525 = vmatpush.msrb.mxu0 %v453_v34  ;;  %546 = vmatpush.msrb.mxu1 %v471_v39 }
  0x6e   : > { %721 = vmatpush.msrb.mxu3 %v477_v29  ;;  %713 = vmatpush.msrb.mxu2 %v453_v34 }
  0x6f   : > { %526 = vmatpush.msrb.mxu0 %v452_v36  ;;  %547 = vmatpush.msrb.mxu1 %v470_v40 }
  0x70   : > { %722 = vmatpush.msrb.mxu3 %v476_v31  ;;  %714 = vmatpush.msrb.mxu2 %v452_v36 }
  0x71   : > { %548 = vmatpush.msrb.mxu1 %v469_v41 }
  0x72   : > { %723 = vmatpush.msrb.mxu3 %v475_v33 }
  0x73   : > { %549 = vmatpush.msrb.mxu1 %v468_v42 }
  0x74   : > { %724 = vmatpush.msrb.mxu3 %v474_v35 }
  0x76   : > { %725 = vmatpush.msrb.mxu3 %v473_v37 }
  0x78   : > { %726 = vmatpush.msrb.mxu3 %v472_v38 }
  0x7a   : > { %727 = vmatpush.msrb.mxu3 %v471_v39 }
  0x7c   : > { %728 = vmatpush.msrb.mxu3 %v470_v40 }
  0x7e   : > { %729 = vmatpush.msrb.mxu3 %v469_v41 }
  0x80   : > { %730 = vmatpush.msrb.mxu3 %v468_v42 }
  0xcd   : > { %v368_v46 = vpop.f32.mrf.mxu0 }
  0xce   : > { %v369_v47 = vadd.f32 %v802_v43, %v368_v46  ;;  %v391_v48 = vpop.f32.mrf.mxu1 }
  0xd0   : > { %v392_v49 = vadd.f32 %v391_v48, %v369_v47 }
  0xd2   : > { %v414_v50 = vpop.f32.mrf.mxu2 }
  0xd3   : > { %v415_v51 = vadd.f32 %v414_v50, %v392_v49 }
  0xd5   : > { %v371_v52 = vpop.f32.mrf.mxu0  ;;  %v420_v53 = vmax.f32 %v415_v51, 0.0 }
  0xd6   : > { %v372_v54 = vadd.f32 %v802_v43, %v371_v52  ;;  %v394_v55 = vpop.f32.mrf.mxu1 }
  0xd7   : > { %527 = vmatmul.f32.vlgmr.msrb.gmra.mxu0 %v420_v53  ;;  %v424_v57 = vrot.slane %v420_v53, 7  ;;  %v430_v61 = vrot.slane %v420_v53, 1 }
  0xd8   : > { %v395_v56 = vadd.f32 %v394_v55, %v372_v54 }
  0xd9   : > { %690 = vmatmul.msk.f32.vlgmr.msra.gmra.mxu3 %vm1142_vm3, %v424_v57 }
  0xda   : > { %v417_v58 = vpop.f32.mrf.mxu2 }
  0xdb   : > { %v418_v59 = vadd.f32 %v417_v58, %v395_v56 }
  0xdd   : > { %v421_v60 = vmax.f32 %v418_v59, 0.0 }
  0xdf   : > { %v431_v63 = vrot.slane %v421_v60, 1  ;;  %530 = vmatmul.f32.vlgmr.msrb.gmra.mxu2 %v421_v60  ;;  %v425_v0 = vrot.slane %v421_v60, 7 }
  0xe1   : > { %v426_v1 = vsel %vm285_vm2, %v424_v57, %v425_v0  ;;  %v432_v2 = vsel %vm292_vm1, %v430_v61, %v431_v63 }
  0xe2   : > { %507 = vmatmul.f32.gmra.mxu3 %v426_v1  ;;  %550 = vmatmul.f32.vlgmr.msrb.gmra.mxu1 %v432_v2 }
  0xea   : > { %691 = vmatmul.msk.f32.vlgmr.msrb.gmra.mxu3 %vm292_vm1, %v431_v63 }
 0x154   : > { %v528_v5 = vpop.f32.mrf.mxu0 }
 0x15c   : > { %v505_v3 = vpop.f32.mrf.mxu3 }
 0x15d   : > { %v506_v4 = vadd.f32 %v803_v62, %v505_v3 }
 0x15f   : > { %v529_v6 = vadd.f32 %v528_v5, %v506_v4  ;;  %v551_v7 = vpop.f32.mrf.mxu1 }
 0x161   : > { %v552_v8 = vadd.f32 %v551_v7, %v529_v6 }
 0x162   : > { %v531_v13 = vpop.f32.mrf.mxu2 }
 0x163   : > { %v557_v9 = vadd.f32 %v552_v8, %v1131_v44 }
 0x165   : > { %v559_v10 = vmax.f32 %v557_v9, 0.0  ;;  %v508_v11 = vpop.f32.mrf.mxu3 }
 0x166   : > { %v509_v12 = vadd.f32 %v803_v62, %v508_v11 }
 0x167   : > { %561 = vst.msk [vmem:[%s277_s12] sm:$0xff] %vm280_vm0, %v559_v10 }
 0x168   : > { %v532_v14 = vadd.f32 %v531_v13, %v509_v12 }
 0x16d   : > { %v554_v15 = vpop.f32.mrf.mxu3 }
 0x16e   : > { %v555_v16 = vadd.f32 %v554_v15, %v532_v14 }
 0x170   : > { %v558_v44 = vadd.f32 %v555_v16, %v1135_v45 }
 0x172   : > { %v560_v17 = vmax.f32 %v558_v44, 0.0 }
 0x174   : > { %562 = vst.msk [vmem:[%s277_s12 + $0x8] sm:$0xff] %vm280_vm0, %v560_v17 }
 0x175   : > { %921 = shalt.err (!%p918_p10)
}
 0x176   : > { %s970_s8 = smov 128   ;;  %s971_s9 = smov 8  }
 0x177   : > { %741 = dma.vmem_to_hbm [thread:$0]  (%p1074_p3), %s577_s6, 256, %s579_s7, %s564_s26, %s970_s8, %s970_s8, %s971_s9  }
 0x178 PF: > { %s593_s12 = sand.u32 1, %s952_s18   ;;  %p1220_p12 = scmp.ge.s32.totalorder %s964_s21, 2 }
 0x179   : > { %s594_s13 = scalar_lea.sflag [#allocation4], %s593_s12 }
 0x17a   : > { %p755_p13 = pnand %p1220_p12, %p1037_p6 }
 0x17c   : > { %p756_p0 = pneg %p755_p13 }
 0x17e   : > { %947 = dma.done.wait (%p756_p0), %s594_s13, 256  }
 0x17f   : > { %949 = vsyncadd (%p756_p0), %s594_s13, 4294967040  ;;  %p19_p5 = scmp.ge.s32.totalorder %s1064_s14, 4   ;;  %s1221_s18 = smov %s956_s19 }
 0x180   : > { %s1222_s19 = smov %s960_s20  ;;  %s1223_s20 = smov %s1080_s23 }
 0x181   : > { %s1224_s21 = smov %s1064_s14  ;;  %21 = sbr.rel (!%p19_p5) target bundleno = 6 (0x6), region = 93 }
 0x186   :  { %600 = vsyncpa [#allocation3], 1 }
 0x187   :  { %602 = vsyncpa [#allocation3 + $0x1], 1 }
 0x188   :  { %603 = vsyncpa [#allocation6], 1 }
 0x189   :  { %604 = vsyncpa [#allocation4], 1 }
 0x18a   :  { %606 = vsyncpa [#allocation4 + $0x1], 1 }

</bundles_post_ra>
